<compile_context>
chip_gen: v6e
topology: v6e:2x2x1
jax: 0.10.0
libtpu: 0.0.40
codegen_flags: <defaults>
</compile_context>

<pallas_src>
import functools

import jax
import jax.numpy as jnp
from jax import lax
from jax.experimental import pallas as pl
from jax.experimental.pallas import tpu as pltpu

_SUBLANE = 8    # f32 sublane multiple
_LANE = 128     # lane multiple


def _fixed_hidden_mlp_kernel(x_ref, wr_ref, b_ref, o_ref, xp_ref, *,
                             batch, d_in, d_out):
    """Fused FixedHiddenMLP forward (one launch, one TensorCore).

    x_ref : (batch, d_in)     unpadded input, VMEM
    wr_ref: (2, 128, 128)     [0] = linear.weight.T zero-padded,
                              [1] = rand_weight zero-padded, VMEM
    b_ref : (1, 128)          linear.bias, zero-padded lanes, VMEM
    o_ref : (batch, d_out)    unpadded output, VMEM
    xp_ref: (bp, 128)         scratch: lane/sublane-dense zero-padded x tile
    """
    # Build a full-vreg tile of x; padded rows/cols are exactly zero.
    xp_ref[...] = jnp.zeros_like(xp_ref)
    xp_ref[:batch, :d_in] = x_ref[...]
    x = xp_ref[...]

    w = wr_ref[0]                                   # (128, 128)
    r = wr_ref[1]                                   # (128, 128)
    b = jnp.broadcast_to(b_ref[...], x.shape)       # sublane broadcast (VPU)

    # X = self.linear(X)
    h = jnp.dot(x, w, preferred_element_type=jnp.float32) + b
    # X = relu(X @ rand_weight + 1)
    h = jnp.maximum(jnp.dot(h, r, preferred_element_type=jnp.float32) + 1.0, 0.0)
    # X = self.linear(X)   (shared weights, reused)
    h = jnp.dot(h, w, preferred_element_type=jnp.float32) + b

    # while X.abs().sum() > 1: X /= 2
    # Padded lanes are exactly zero after the final linear (zero weight
    # columns and zero bias lanes), so only padded ROWS are masked out.
    row = lax.broadcasted_iota(jnp.int32, h.shape, 0)
    s0 = jnp.sum(jnp.where(row < batch, jnp.abs(h), 0.0), keepdims=True)  # (1,1)

    # Halving by 2 is exact in f32, so the loop runs exactly
    # k = max(0, ceil(log2(s0))) times.  Compute ceil(log2) bit-exactly from
    # the exponent/mantissa and build scale = 2**-k exactly from its bits.
    bits = pltpu.bitcast(s0, jnp.int32)             # s0 >= 0 -> sign bit clear
    exp = (bits >> 23) - 127                        # unbiased exponent
    mant = bits & 0x7FFFFF
    ceil_log2 = jnp.where(mant == 0, exp, exp + 1)
    k = jnp.where(s0 > 1.0, ceil_log2, 0)
    k = jnp.clip(k, 0, 126)                         # stay in normal-float range
    scale = pltpu.bitcast((127 - k) << 23, jnp.float32)   # exact 2**-k, (1,1)

    o_ref[...] = (h[:batch, :d_out] * scale).astype(o_ref.dtype)


def init_fixed_hidden_mlp_params(lin_weight, lin_bias, rand_weight):
    """Pre-pad all constant operands ONCE (module init), not per forward call."""
    d_out, d_in = lin_weight.shape
    f32 = jnp.float32
    w_pad = jnp.zeros((_LANE, _LANE), f32).at[:d_in, :d_out].set(
        lin_weight.T.astype(f32))
    r_pad = jnp.zeros((_LANE, _LANE), f32).at[:d_out, :d_out].set(
        rand_weight.astype(f32))
    wr_pad = jnp.stack([w_pad, r_pad])              # one array -> one input DMA
    b_row = jnp.zeros((1, _LANE), f32).at[0, :d_out].set(lin_bias.astype(f32))
    return jax.device_put(wr_pad), jax.device_put(b_row)


@functools.partial(jax.jit, static_argnames=("d_out",))
def fixed_hidden_mlp_forward(x, wr_pad, b_row, *, d_out=20):
    """x: (B, d_in) unpadded; wr_pad/b_row: pre-padded constants from init."""
    B, d_in = x.shape
    assert d_in <= _LANE and d_out <= _LANE
    bp = pl.cdiv(B, _SUBLANE) * _SUBLANE

    kernel = functools.partial(_fixed_hidden_mlp_kernel,
                               batch=B, d_in=d_in, d_out=d_out)
    vmem = pl.BlockSpec(memory_space=pltpu.MemorySpace.VMEM)

    return pl.pallas_call(
        kernel,
        out_shape=jax.ShapeDtypeStruct((B, d_out), jnp.float32),
        in_specs=[vmem, vmem, vmem],
        out_specs=vmem,
        scratch_shapes=[pltpu.VMEM((bp, _LANE), jnp.float32)],
        cost_estimate=pl.CostEstimate(
            flops=3 * 2 * B * d_in * d_out,
            transcendentals=0,
            bytes_accessed=4 * (B * d_in + wr_pad.size + b_row.size + B * d_out),
        ),
    )(x.astype(jnp.float32), wr_pad, b_row)


if __name__ == "__main__":
    key = jax.random.PRNGKey(0)
    k_x, k_w, k_b, k_r = jax.random.split(key, 4)

    batch, d = 2, 20  # FixedHiddenMLP uses Linear(20, 20), so X is (batch, 20)

    # torch.rand -> U[0,1); nn.Linear default init -> U(-1/sqrt(in), 1/sqrt(in))
    x = jax.random.uniform(k_x, (batch, d), dtype=jnp.float32)
    bound = 1.0 / (d ** 0.5)
    lin_weight = jax.random.uniform(k_w, (d, d), dtype=jnp.float32,
                                    minval=-bound, maxval=bound)
    lin_bias = jax.random.uniform(k_b, (d,), dtype=jnp.float32,
                                  minval=-bound, maxval=bound)
    rand_weight = jax.random.uniform(k_r, (d, d), dtype=jnp.float32)

    # Module "init": pad constants once, keep them resident on device.
    wr_pad, b_row = init_fixed_hidden_mlp_params(lin_weight, lin_bias, rand_weight)

    out = fixed_hidden_mlp_forward(x, wr_pad, b_row, d_out=d)
    out = jax.block_until_ready(out)

    # Plain-JAX reference of the exact PyTorch forward (eager, concrete while).
    hp = lax.Precision.HIGHEST
    h = jnp.dot(x, lin_weight.T, precision=hp) + lin_bias
    h = jnp.maximum(jnp.dot(h, rand_weight, precision=hp) + 1.0, 0.0)
    h = jnp.dot(h, lin_weight.T, precision=hp) + lin_bias
    while float(jnp.sum(jnp.abs(h))) > 1.0:
        h = h / 2.0

    assert out.shape == (batch, d)
    assert jnp.allclose(out, h, atol=1e-4, rtol=1e-4), (
        f"mismatch vs reference: max|diff|={float(jnp.max(jnp.abs(out - h)))}")
    print("KERNEL_OK")
</pallas_src>

<mosaic_0001>
module attributes {stable_mosaic.version = 11 : i64} {
  func.func @_fixed_hidden_mlp_kernel(%arg0: memref<2x20xf32, #tpu.memory_space<vmem>>, %arg1: memref<2x128x128xf32, #tpu.memory_space<vmem>>, %arg2: memref<1x128xf32, #tpu.memory_space<vmem>>, %arg3: memref<2x20xf32, #tpu.memory_space<vmem>>, %arg4: memref<8x128xf32, #tpu.memory_space<vmem>>) attributes {dimension_semantics = [], scalar_prefetch = 0 : i64, scratch_operands = 1 : i64, tpu.core_type = #tpu.core_type<tc>} {
    %cst = arith.constant 0.000000e+00 : f32
    %0 = vector.broadcast %cst : f32 to vector<8x128xf32>
    %c0 = arith.constant 0 : index
    %c0_0 = arith.constant 0 : index
    %1 = vector.load %arg4[%c0, %c0_0] : memref<8x128xf32, #tpu.memory_space<vmem>>, vector<8x128xf32>
    tpu.vector_store %arg4[%c0, %c0_0], %0 {strides = array<i32>} : memref<8x128xf32, #tpu.memory_space<vmem>>, vector<8x128xf32>,
    %c0_1 = arith.constant 0 : index
    %c0_2 = arith.constant 0 : index
    %2 = vector.load %arg0[%c0_1, %c0_2] : memref<2x20xf32, #tpu.memory_space<vmem>>, vector<2x20xf32>
    %c0_3 = arith.constant 0 : index
    %c0_4 = arith.constant 0 : index
    %3 = vector.load %arg4[%c0_3, %c0_4] : memref<8x128xf32, #tpu.memory_space<vmem>>, vector<2x20xf32>
    tpu.vector_store %arg4[%c0_3, %c0_4], %2 {strides = array<i32>} : memref<8x128xf32, #tpu.memory_space<vmem>>, vector<2x20xf32>,
    %c0_5 = arith.constant 0 : index
    %c0_6 = arith.constant 0 : index
    %4 = vector.load %arg4[%c0_5, %c0_6] : memref<8x128xf32, #tpu.memory_space<vmem>>, vector<8x128xf32>
    %c0_7 = arith.constant 0 : index
    %c0_8 = arith.constant 0 : index
    %c0_9 = arith.constant 0 : index
    %5 = vector.load %arg1[%c0_7, %c0_8, %c0_9] : memref<2x128x128xf32, #tpu.memory_space<vmem>>, vector<1x128x128xf32>
    %6 = vector.shape_cast %5 : vector<1x128x128xf32> to vector<128x128xf32>
    %c1 = arith.constant 1 : index
    %c0_10 = arith.constant 0 : index
    %c0_11 = arith.constant 0 : index
    %7 = vector.load %arg1[%c1, %c0_10, %c0_11] : memref<2x128x128xf32, #tpu.memory_space<vmem>>, vector<1x128x128xf32>
    %8 = vector.shape_cast %7 : vector<1x128x128xf32> to vector<128x128xf32>
    %c0_12 = arith.constant 0 : index
    %c0_13 = arith.constant 0 : index
    %9 = vector.load %arg2[%c0_12, %c0_13] : memref<1x128xf32, #tpu.memory_space<vmem>>, vector<1x128xf32>
    %10 = vector.shape_cast %9 : vector<1x128xf32> to vector<1x128xf32>
    %11 = vector.broadcast %10 : vector<1x128xf32> to vector<8x128xf32>
    %cst_14 = arith.constant dense<0.000000e+00> : vector<8x128xf32>
    %12 = tpu.matmul %4, %6, %cst_14 {dimension_numbers = #tpu.dot_dimension_numbers<[1], [0], [0], [1], [0, 0, 1, 1], [], []>} : vector<8x128xf32>, vector<128x128xf32>, vector<8x128xf32> -> vector<8x128xf32>
    %13 = arith.addf %12, %11 : vector<8x128xf32>
    %cst_15 = arith.constant dense<0.000000e+00> : vector<8x128xf32>
    %14 = tpu.matmul %13, %8, %cst_15 {dimension_numbers = #tpu.dot_dimension_numbers<[1], [0], [0], [1], [0, 0, 1, 1], [], []>} : vector<8x128xf32>, vector<128x128xf32>, vector<8x128xf32> -> vector<8x128xf32>
    %cst_16 = arith.constant 1.000000e+00 : f32
    %15 = vector.broadcast %cst_16 : f32 to vector<8x128xf32>
    %16 = arith.addf %14, %15 : vector<8x128xf32>
    %cst_17 = arith.constant 0.000000e+00 : f32
    %17 = vector.broadcast %cst_17 : f32 to vector<8x128xf32>
    %18 = arith.maximumf %16, %17 : vector<8x128xf32>
    %cst_18 = arith.constant dense<0.000000e+00> : vector<8x128xf32>
    %19 = tpu.matmul %18, %6, %cst_18 {dimension_numbers = #tpu.dot_dimension_numbers<[1], [0], [0], [1], [0, 0, 1, 1], [], []>} : vector<8x128xf32>, vector<128x128xf32>, vector<8x128xf32> -> vector<8x128xf32>
    %20 = arith.addf %19, %11 : vector<8x128xf32>
    %21 = tpu.iota {dimensions = array<i32: 0>} : vector<8x128xi32>
    %c2_i32 = arith.constant 2 : i32
    %22 = vector.broadcast %c2_i32 : i32 to vector<8x128xi32>
    %23 = arith.cmpi slt, %21, %22 : vector<8x128xi32>
    %24 = math.absf %20 : vector<8x128xf32>
    %cst_19 = arith.constant 0.000000e+00 : f32
    %25 = vector.broadcast %cst_19 : f32 to vector<8x128xf32>
    %26 = arith.select %23, %24, %25 : vector<8x128xi1>, vector<8x128xf32>
    %27 = vector.shape_cast %26 : vector<8x128xf32> to vector<1x8x128xf32>
    %cst_20 = arith.constant dense<0.000000e+00> : vector<1xf32>
    %28 = vector.multi_reduction <add>, %27, %cst_20 [1, 2] : vector<1x8x128xf32> to vector<1xf32>
    %29 = vector.shape_cast %28 : vector<1xf32> to vector<1x1x1xf32>
    %30 = vector.extract %29[0, 0, 0] : f32 from vector<1x1x1xf32>
    %31 = vector.broadcast %30 : f32 to vector<1x1xf32>
    %32 = tpu.bitcast %31 : vector<1x1xf32> -> vector<1x1xi32>
    %c23_i32 = arith.constant 23 : i32
    %33 = vector.broadcast %c23_i32 : i32 to vector<1x1xi32>
    %34 = arith.shrsi %32, %33 : vector<1x1xi32>
    %c127_i32 = arith.constant 127 : i32
    %35 = vector.broadcast %c127_i32 : i32 to vector<1x1xi32>
    %36 = arith.subi %34, %35 : vector<1x1xi32>
    %c8388607_i32 = arith.constant 8388607 : i32
    %37 = vector.broadcast %c8388607_i32 : i32 to vector<1x1xi32>
    %38 = arith.andi %32, %37 : vector<1x1xi32>
    %c0_i32 = arith.constant 0 : i32
    %39 = vector.broadcast %c0_i32 : i32 to vector<1x1xi32>
    %40 = arith.cmpi eq, %38, %39 : vector<1x1xi32>
    %c1_i32 = arith.constant 1 : i32
    %41 = vector.broadcast %c1_i32 : i32 to vector<1x1xi32>
    %42 = arith.addi %36, %41 : vector<1x1xi32>
    %43 = arith.select %40, %36, %42 : vector<1x1xi1>, vector<1x1xi32>
    %cst_21 = arith.constant 1.000000e+00 : f32
    %44 = vector.broadcast %cst_21 : f32 to vector<1x1xf32>
    %45 = arith.cmpf ogt, %31, %44 : vector<1x1xf32>
    %c0_i32_22 = arith.constant 0 : i32
    %46 = vector.broadcast %c0_i32_22 : i32 to vector<1x1xi32>
    %47 = arith.select %45, %43, %46 : vector<1x1xi1>, vector<1x1xi32>
    %c0_i32_23 = arith.constant 0 : i32
    %c126_i32 = arith.constant 126 : i32
    %48 = vector.broadcast %c0_i32_23 : i32 to vector<1x1xi32>
    %49 = arith.maxsi %48, %47 : vector<1x1xi32>
    %50 = vector.broadcast %c126_i32 : i32 to vector<1x1xi32>
    %51 = arith.minsi %50, %49 : vector<1x1xi32>
    %c127_i32_24 = arith.constant 127 : i32
    %52 = vector.broadcast %c127_i32_24 : i32 to vector<1x1xi32>
    %53 = arith.subi %52, %51 : vector<1x1xi32>
    %c23_i32_25 = arith.constant 23 : i32
    %54 = vector.broadcast %c23_i32_25 : i32 to vector<1x1xi32>
    %55 = arith.shli %53, %54 : vector<1x1xi32>
    %56 = tpu.bitcast %55 : vector<1x1xi32> -> vector<1x1xf32>
    %57 = vector.extract_strided_slice %20 {offsets = [0, 0], sizes = [2, 20], strides = [1, 1]} : vector<8x128xf32> to vector<2x20xf32>
    %58 = vector.broadcast %56 : vector<1x1xf32> to vector<2x20xf32>
    %59 = arith.mulf %57, %58 : vector<2x20xf32>
    %c0_26 = arith.constant 0 : index
    %c0_27 = arith.constant 0 : index
    %60 = vector.load %arg3[%c0_26, %c0_27] : memref<2x20xf32, #tpu.memory_space<vmem>>, vector<2x20xf32>
    tpu.vector_store %arg3[%c0_26, %c0_27], %59 {strides = array<i32>} : memref<2x20xf32, #tpu.memory_space<vmem>>, vector<2x20xf32>,
    return
  }
}

</mosaic_0001>

<bundles_post_ra>
// kernel: fixed_hidden_mlp_forward.1
= control target key start
LH: loop header
LB: loop body
LE: loop exit
PB: predicated region body
PF: predicated region fallthrough
CT: control target
= control target key end

     0   :  { %8 = vsyncpa [#allocation4], 0  ;;  %s719_s0 = inlined_call_operand.hbm [shape: f32[2,20], index: 0, kind: input, shape index: {}]   ;;  %s720_s1 = inlined_call_operand.hbm [shape: f32[2,128,128], index: 1, kind: input, shape index: {}]   ;;  %s721_s2 = inlined_call_operand.vmem [shape: f32[1,128], index: 2, kind: input, shape index: {}]   ;;  %s722_s3 = inlined_call_operand.hbm [shape: f32[2,20], index: 3, kind: output, shape index: {}]  }
   0x1   :  { %9 = vsyncpa [#allocation7], 0 }
   0x2   :  { %10 = vsyncpa [#allocation5], 0  ;;  %s579_s12 = smov [#allocation3]   ;;  %s580_s14 = smov [#allocation6]  }
   0x3   :  { %s17_s13 = sshll.u32 %s579_s12, 4  ;;  %s26_s15 = sshll.u32 %s580_s14, 4  ;;  %s18_s13 = int_to_ptr.vmem [resolvable:$true] %s17_s13  ;;  %s27_s15 = int_to_ptr.vmem [resolvable:$true] %s26_s15 }
   0x4   :  { %s521_s16 = scalar_lea.vmem %s18_s13, 32  ;;  %p526_p1 = scmp.lt.s32.totalorder %s18_s13, %s18_s13 }
   0x5   :  { %p522_p0 = scmp.ne.s32.totalorder %s18_s13, %s521_s16  ;;  %p527_p2 = scmp.lt.s32.totalorder %s521_s16, %s521_s16 }
   0x7   :  { %p528_p3 = por %p527_p2, %p526_p1 }
   0x9   :  { %p529_p4 = pnand %p528_p3, %p522_p0 }
   0xb   :  { %532 = shalt.err (!%p529_p4)
}
   0xc   :  { %20 = dma.hbm_to_vmem [thread:$0]  %s719_s0, 32, %s18_s13, [#allocation4]  }
   0xd   :  { %s541_s19 = scalar_lea.vmem %s27_s15, 4096  ;;  %p546_p6 = scmp.lt.s32.totalorder %s27_s15, %s27_s15 }
   0xe   :  { %p542_p5 = scmp.ne.s32.totalorder %s27_s15, %s541_s19  ;;  %p547_p7 = scmp.lt.s32.totalorder %s541_s19, %s541_s19 }
  0x10   :  { %p548_p8 = por %p547_p7, %p546_p6 }
  0x12   :  { %p549_p9 = pnand %p548_p8, %p542_p5 }
  0x14   :  { %552 = shalt.err (!%p549_p9)
}
  0x15   :  { %s581_s20 = smov 128   ;;  %s582_s21 = smov 8  }
  0x16   :  { %32 = dma.hbm_to_vmem [thread:$0]  %s720_s1, 4096, %s27_s15, [#allocation7], %s581_s20, %s581_s20, %s582_s21  }
  0x17   :  { %573 = dma.done.wait [#allocation4], 32  }
  0x18   :  { %574 = vsyncadd [#allocation4], 4294967264 }
  0x19   :  { %575 = dma.done.wait [#allocation7], 4096  }
  0x1a   :  { %576 = vsyncadd [#allocation7], 4294963200  ;;  %v583_v0 = vmov 0.0   ;;  %vm584_vm0 = vmmov 0   ;;  %v619_v1 = vld [vmem:[#allocation6 + $0x78] sm:$0xff]  ;;  %v621_v2 = vld [vmem:[#allocation6 + $0x70] sm:$0xff]  ;;  %v297_v43 = vlaneseq }
  0x1b   :  { %399 = vmatprep.subr.mxu0 %v583_v0  ;;  %41 = vst [vmem:[#allocation2] sm:$0xff] %v583_v0  ;;  %431 = vmatprep.mubr.msk.f32.mxu0 %vm584_vm0, %v583_v0  ;;  %v625_v3 = vld [vmem:[#allocation6 + $0x68] sm:$0xff]  ;;  %vm43_vm1 = vcmask 156672   ;;  %v629_v4 = vld [vmem:[#allocation6 + $0x60] sm:$0xff]  ;;  %v42_v5 = vld [vmem:[#allocation3] sm:$0x3] }
  0x1c   :  { %434 = vmatprep.subr.mxu1 %v583_v0  ;;  %466 = vmatprep.mubr.msk.f32.mxu1 %vm584_vm0, %v583_v0  ;;  %v78_v6 = vld [vmem:[#allocation6 + $0xf8] sm:$0xff]  ;;  %44 = vst.msk [vmem:[#allocation2] sm:$0x3] %vm43_vm1, %v42_v5  ;;  %v77_v8 = vld [vmem:[#allocation6 + $0xf0] sm:$0xff]  ;;  %v76_v9 = vld [vmem:[#allocation6 + $0xe8] sm:$0xff]  ;;  %v298_v44 = vshrl.u32 %v297_v43, 7 }
  0x1d   :  { %400 = vmatpush3.msra.mxu0 %v619_v1  ;;  %v633_v7 = vld [vmem:[#allocation6 + $0x58] sm:$0xff]  ;;  %435 = vmatpush3.msra.mxu1 %v78_v6  ;;  %v639_v10 = vld [vmem:[#allocation6 + $0x50] sm:$0xff]  ;;  %v75_v11 = vld [vmem:[#allocation6 + $0xe0] sm:$0xff]  ;;  %s585_s24 = smov [#allocation8]  }
  0x1e   :  { %401 = vmatprep.subr.mxu0 %v583_v0  ;;  %436 = vmatprep.subr.mxu1 %v583_v0  ;;  %v644_v12 = vld [vmem:[#allocation6 + $0x48] sm:$0xff]  ;;  %v74_v13 = vld [vmem:[#allocation6 + $0xd8] sm:$0xff]  ;;  %v649_v14 = vld [vmem:[#allocation6 + $0x40] sm:$0xff]  ;;  %vm299_vm2 = vcmp.lt.s32.totalorder %v298_v44, 2  ;;  %s336_s25 = sshll.u32 %s585_s24, 4  ;;  %s337_s25 = int_to_ptr.vmem [resolvable:$true] %s336_s25 }
  0x1f   :  { %402 = vmatpush3.msra.mxu0 %v621_v2  ;;  %437 = vmatpush3.msra.mxu1 %v77_v8  ;;  %v73_v15 = vld [vmem:[#allocation6 + $0xd0] sm:$0xff]  ;;  %v654_v16 = vld [vmem:[#allocation6 + $0x38] sm:$0xff]  ;;  %v72_v17 = vld [vmem:[#allocation6 + $0xc8] sm:$0xff]  ;;  %s553_s26 = scalar_lea.vmem %s337_s25, 32  ;;  %p558_p11 = scmp.lt.s32.totalorder %s337_s25, %s337_s25 }
  0x20   :  { %403 = vmatprep.subr.mxu0 %v583_v0  ;;  %438 = vmatprep.subr.mxu1 %v583_v0  ;;  %v659_v18 = vld [vmem:[#allocation6 + $0x30] sm:$0xff]  ;;  %v71_v19 = vld [vmem:[#allocation6 + $0xc0] sm:$0xff]  ;;  %v664_v20 = vld [vmem:[#allocation6 + $0x28] sm:$0xff]  ;;  %p554_p10 = scmp.ne.s32.totalorder %s337_s25, %s553_s26  ;;  %p559_p12 = scmp.lt.s32.totalorder %s553_s26, %s553_s26 }
  0x21   :  { %404 = vmatpush3.msra.mxu0 %v625_v3  ;;  %439 = vmatpush3.msra.mxu1 %v76_v9  ;;  %v70_v21 = vld [vmem:[#allocation6 + $0xb8] sm:$0xff]  ;;  %v50_v22 = vld [vmem:[#allocation6 + $0x20] sm:$0xff]  ;;  %v69_v23 = vld [vmem:[#allocation6 + $0xb0] sm:$0xff] }
  0x22   :  { %405 = vmatprep.subr.mxu0 %v583_v0  ;;  %440 = vmatprep.subr.mxu1 %v583_v0  ;;  %v49_v24 = vld [vmem:[#allocation6 + $0x18] sm:$0xff]  ;;  %v68_v25 = vld [vmem:[#allocation6 + $0xa8] sm:$0xff]  ;;  %v48_v26 = vld [vmem:[#allocation6 + $0x10] sm:$0xff]  ;;  %p560_p13 = por %p559_p12, %p558_p11 }
  0x23   :  { %406 = vmatpush3.msra.mxu0 %v629_v4  ;;  %441 = vmatpush3.msra.mxu1 %v75_v11  ;;  %v67_v27 = vld [vmem:[#allocation6 + $0xa0] sm:$0xff]  ;;  %v47_v28 = vld [vmem:[#allocation6 + $0x8] sm:$0xff]  ;;  %v66_v29 = vld [vmem:[#allocation6 + $0x98] sm:$0xff] }
  0x24   :  { %407 = vmatprep.subr.mxu0 %v583_v0  ;;  %442 = vmatprep.subr.mxu1 %v583_v0  ;;  %v46_v30 = vld [vmem:[#allocation6] sm:$0xff]  ;;  %v45_v31 = vld [vmem:[#allocation2] sm:$0xff]  ;;  %v64_v33 = vld [vmem:[#allocation6 + $0x88] sm:$0xff]  ;;  %p561_p0 = pnand %p560_p13, %p554_p10 }
  0x25   :  { %408 = vmatpush3.msra.mxu0 %v633_v7  ;;  %443 = vmatpush3.msra.mxu1 %v74_v13  ;;  %v65_v32 = vld [vmem:[#allocation6 + $0x90] sm:$0xff]  ;;  %v63_v34 = vld [vmem:[#allocation6 + $0x80] sm:$0xff] }
  0x26   :  { %409 = vmatprep.subr.mxu0 %v583_v0  ;;  %444 = vmatprep.subr.mxu1 %v583_v0  ;;  %v346_v35 = vld [vmem:[%s721_s2] ss:$0 sm:$0xff] }
  0x27   :  { %410 = vmatpush3.msra.mxu0 %v639_v10  ;;  %445 = vmatpush3.msra.mxu1 %v73_v15 }
  0x28   :  { %411 = vmatprep.subr.mxu0 %v583_v0  ;;  %446 = vmatprep.subr.mxu1 %v583_v0 }
  0x29   :  { %412 = vmatpush3.msra.mxu0 %v644_v12  ;;  %447 = vmatpush3.msra.mxu1 %v72_v17 }
  0x2a   :  { %413 = vmatprep.subr.mxu0 %v583_v0  ;;  %448 = vmatprep.subr.mxu1 %v583_v0 }
  0x2b   :  { %414 = vmatpush3.msra.mxu0 %v649_v14  ;;  %449 = vmatpush3.msra.mxu1 %v71_v19 }
  0x2c   :  { %415 = vmatprep.subr.mxu0 %v583_v0  ;;  %450 = vmatprep.subr.mxu1 %v583_v0 }
  0x2d   :  { %416 = vmatpush3.msra.mxu0 %v654_v16  ;;  %451 = vmatpush3.msra.mxu1 %v70_v21 }
  0x2e   :  { %417 = vmatprep.subr.mxu0 %v583_v0  ;;  %452 = vmatprep.subr.mxu1 %v583_v0 }
  0x2f   :  { %418 = vmatpush3.msra.mxu0 %v659_v18  ;;  %453 = vmatpush3.msra.mxu1 %v69_v23 }
  0x30   :  { %419 = vmatprep.subr.mxu0 %v583_v0  ;;  %454 = vmatprep.subr.mxu1 %v583_v0 }
  0x31   :  { %420 = vmatpush3.msra.mxu0 %v664_v20  ;;  %455 = vmatpush3.msra.mxu1 %v68_v25 }
  0x32   :  { %421 = vmatprep.subr.mxu0 %v583_v0  ;;  %456 = vmatprep.subr.mxu1 %v583_v0 }
  0x33   :  { %422 = vmatpush3.msra.mxu0 %v50_v22  ;;  %457 = vmatpush3.msra.mxu1 %v67_v27 }
  0x34   :  { %423 = vmatprep.subr.mxu0 %v583_v0  ;;  %458 = vmatprep.subr.mxu1 %v583_v0 }
  0x35   :  { %424 = vmatpush3.msra.mxu0 %v49_v24  ;;  %459 = vmatpush3.msra.mxu1 %v66_v29 }
  0x36   :  { %425 = vmatprep.subr.mxu0 %v583_v0  ;;  %460 = vmatprep.subr.mxu1 %v583_v0 }
  0x37   :  { %426 = vmatpush3.msra.mxu0 %v48_v26  ;;  %461 = vmatpush3.msra.mxu1 %v65_v32 }
  0x38   :  { %427 = vmatprep.subr.mxu0 %v583_v0  ;;  %462 = vmatprep.subr.mxu1 %v583_v0 }
  0x39   :  { %428 = vmatpush3.msra.mxu0 %v47_v28  ;;  %463 = vmatpush3.msra.mxu1 %v64_v33 }
  0x3a   :  { %429 = vmatprep.subr.mxu0 %v583_v0  ;;  %464 = vmatprep.subr.mxu1 %v583_v0 }
  0x3b   :  { %430 = vmatpush3.msra.mxu0 %v46_v30  ;;  %465 = vmatpush3.msra.mxu1 %v63_v34 }
  0x3c   :  { %432 = vmatmul.mubr.f32.vlgmr.msra.gmra.mxu0 %v45_v31  ;;  %469 = vmatprep.subr.mxu0 %v583_v0 }
  0x3d   :  { %470 = vmatpush3.msra.mxu0 %v619_v1  ;;  %501 = vmatprep.mubr.msk.f32.mxu0 %vm584_vm0, %v583_v0 }
  0x3e   :  { %471 = vmatprep.subr.mxu0 %v583_v0 }
  0x3f   :  { %472 = vmatpush3.msra.mxu0 %v621_v2 }
  0x40   :  { %473 = vmatprep.subr.mxu0 %v583_v0 }
  0x41   :  { %474 = vmatpush3.msra.mxu0 %v625_v3 }
  0x42   :  { %475 = vmatprep.subr.mxu0 %v583_v0 }
  0x43   :  { %476 = vmatpush3.msra.mxu0 %v629_v4 }
  0x44   :  { %477 = vmatprep.subr.mxu0 %v583_v0 }
  0x45   :  { %478 = vmatpush3.msra.mxu0 %v633_v7 }
  0x46   :  { %479 = vmatprep.subr.mxu0 %v583_v0 }
  0x47   :  { %480 = vmatpush3.msra.mxu0 %v639_v10 }
  0x48   :  { %481 = vmatprep.subr.mxu0 %v583_v0 }
  0x49   :  { %482 = vmatpush3.msra.mxu0 %v644_v12 }
  0x4a   :  { %483 = vmatprep.subr.mxu0 %v583_v0 }
  0x4b   :  { %484 = vmatpush3.msra.mxu0 %v649_v14 }
  0x4c   :  { %485 = vmatprep.subr.mxu0 %v583_v0 }
  0x4d   :  { %486 = vmatpush3.msra.mxu0 %v654_v16 }
  0x4e   :  { %487 = vmatprep.subr.mxu0 %v583_v0 }
  0x4f   :  { %488 = vmatpush3.msra.mxu0 %v659_v18 }
  0x50   :  { %489 = vmatprep.subr.mxu0 %v583_v0 }
  0x51   :  { %490 = vmatpush3.msra.mxu0 %v664_v20 }
  0x52   :  { %491 = vmatprep.subr.mxu0 %v583_v0 }
  0x53   :  { %492 = vmatpush3.msra.mxu0 %v50_v22 }
  0x54   :  { %493 = vmatprep.subr.mxu0 %v583_v0 }
  0x55   :  { %494 = vmatpush3.msra.mxu0 %v49_v24 }
  0x56   :  { %495 = vmatprep.subr.mxu0 %v583_v0 }
  0x57   :  { %496 = vmatpush3.msra.mxu0 %v48_v26 }
  0x58   :  { %497 = vmatprep.subr.mxu0 %v583_v0 }
  0x59   :  { %498 = vmatpush3.msra.mxu0 %v47_v28 }
  0x5a   :  { %499 = vmatprep.subr.mxu0 %v583_v0 }
  0x5b   :  { %500 = vmatpush3.msra.mxu0 %v46_v30 }
  0xfc   :  { %v152_v36 = vpop.f32.mrf.mxu0 }
  0xfd   :  { %v153_v37 = vadd.f32 %v346_v35, %v152_v36 }
  0xfe   :  { %v433_v38 = vpop.f32.mrf.mxu0 }
  0xff   :  { %467 = vmatmul.mubr.f32.vlgmr.msra.gmra.mxu1 %v153_v37 }
 0x1bf   :  { %v222_v39 = vpop.f32.mrf.mxu1 }
 0x1c0   :  { %v223_v40 = vadd.f32 1.0, %v222_v39 }
 0x1c1   :  { %v468_v41 = vpop.f32.mrf.mxu1 }
 0x1c2   :  { %v226_v42 = vmax.f32 %v223_v40, 0.0 }
 0x1c4   :  { %502 = vmatmul.mubr.f32.vlgmr.msra.gmra.mxu0 %v226_v42 }
 0x284   :  { %v293_v45 = vpop.f32.mrf.mxu0 }
 0x285   :  { %v294_v46 = vadd.f32 %v346_v35, %v293_v45 }
 0x286   :  { %v503_v47 = vpop.f32.mrf.mxu0 }
 0x287   :  { %v300_v48 = vand.u32 2147483647, %v294_v46 }
 0x289   :  { %v301_v49 = vsel %vm299_vm2, %v300_v48, 0.0 }
 0x28a   :  { %302 = vadd.xlane.f32.xlu0 %v301_v49 }
 0x313   :  { %v303_v50 = vpop.xlane.xlu0 %302 }
 0x314   :  { %v304_v51 = vrot.slane %v303_v50, 4 }
 0x316   :  { %v305_v52 = vadd.f32 %v304_v51, %v303_v50 }
 0x318   :  { %v306_v53 = vrot.slane %v305_v52, 2 }
 0x31a   :  { %v307_v54 = vadd.f32 %v306_v53, %v305_v52 }
 0x31c   :  { %v308_v55 = vrot.slane %v307_v54, 1 }
 0x31e   :  { %v309_v56 = vadd.f32 %v308_v55, %v307_v54 }
 0x320   :  { %504 = vpush %v309_v56 }
 0x351   :  { %s505_s2 = spop %504 }
 0x352   :  { %v311_v57 = vstv %s505_s2 }
 0x353   :  { %v313_v58 = vshra.s32 %v311_v57, 23  ;;  %v315_v59 = vand.u32 8388607, %v311_v57  ;;  %vm319_vm4 = vcmp.gt.f32.partialorder %v311_v57, 1.0 }
 0x355   :  { %v347_v60 = vadd.s32 4294967169, %v313_v58  ;;  %vm316_vm3 = vcmp.eq.s32.totalorder %v315_v59, 0 }
 0x357   :  { %v317_v61 = vadd.s32 1, %v347_v60 }
 0x359   :  { %v318_v62 = vsel %vm316_vm3, %v347_v60, %v317_v61 }
 0x35a   :  { %v320_v63 = vsel %vm319_vm4, %v318_v62, 0 }
 0x35b   :  { %vm321_vm5 = vcmp.gt.s32.totalorder %v320_v63, 0 }
 0x35c   :  { %v322_v0 = vsel %vm321_vm5, %v320_v63, 0 }
 0x35d   :  { %vm323_vm6 = vcmp.lt.s32.totalorder %v322_v0, 126 }
 0x35e   :  { %v324_v1 = vsel %vm323_vm6, %v322_v0, 126 }
 0x35f   :  { %v325_v2 = vsub.s32 127, %v324_v1 }
 0x361   :  { %v326_v3 = vshll.u32 %v325_v2, 23 }
 0x363   :  { %v328_v4 = vmul.f32 %v326_v3, %v294_v46 }
 0x365   :  { %329 = vst.msk [vmem:[#allocation8] sm:$0x3] %vm43_vm1, %v328_v4 }
 0x366   :  { %564 = shalt.err (!%p561_p0)
}
 0x367   :  { %339 = dma.vmem_to_hbm [thread:$0]  %s337_s25, 32, %s722_s3, [#allocation5]  }
 0x368   :  { %577 = dma.done.wait [#allocation5], 32  }
 0x369   :  { %578 = vsyncadd [#allocation5], 4294967264 }
 0x36a   :  { %343 = vsyncpa [#allocation4], 1 }
 0x36b   :  { %344 = vsyncpa [#allocation7], 1 }
 0x36c   :  { %345 = vsyncpa [#allocation5], 1 }

</bundles_post_ra>
